<compile_context>
chip_gen: v6e
topology: v6e:2x2x1
jax: 0.10.0
libtpu: 0.0.40
codegen_flags: <defaults>
</compile_context>

<pallas_src>
import functools

import jax
import jax.numpy as jnp
from jax.experimental import pallas as pl
from jax.experimental.pallas import tpu as pltpu


def _nconv_kernel(x_ref, at_ref, o_ref, *, bt):
    # x_ref : (bt, v, lt)   -- v on sublanes, l on lanes (natural HBM layout)
    # at_ref: (w, v)        -- A^T, VMEM-resident (constant index_map)
    # o_ref : (bt, w, lt)
    a = at_ref[...]
    for i in range(bt):  # static unroll; bt is a small compile-time constant
        o_ref[i] = jnp.dot(
            a, x_ref[i], preferred_element_type=jnp.float32
        ).astype(o_ref.dtype)


def nconv(x, A, *, bt=None, lt=None):
    """x: (n, c, v, l) f32, A: (v, w) f32 -> (n, c, w, l) f32."""
    n, c, v, l = x.shape
    v_a, w = A.shape
    assert v == v_a, "contraction dims must match"
    B = n * c

    x3 = x.reshape(B, v, l)  # pure view, no data movement
    At = A.T                 # tiny (w, v); one-off, negligible vs x traffic

    # Lane tile: must be a multiple of 128 or the full l extent.
    if lt is None:
        lt = min(l, 512) if (l % 128 == 0) else l

    # Batch tile: amortize per-grid-step overhead while keeping the
    # double-buffered working set well inside scoped VMEM on v5e/v6e/v7x.
    if bt is None:
        bytes_per_b = (v + w) * lt * 4          # x block + out block, f32
        budget = 4 * 1024 * 1024                # ~4 MiB -> <=8 MiB double-buffered
        bt = max(1, min(B, budget // max(1, bytes_per_b)))
        bt = min(bt, 32)                        # cap the static unroll

    grid = (pl.cdiv(B, bt), pl.cdiv(l, lt))

    out3 = pl.pallas_call(
        functools.partial(_nconv_kernel, bt=bt),
        out_shape=jax.ShapeDtypeStruct((B, w, l), x.dtype),
        grid_spec=pltpu.PrefetchScalarGridSpec(
            num_scalar_prefetch=0,
            grid=grid,
            in_specs=[
                pl.BlockSpec((bt, v, lt), lambda b, j: (b, 0, j)),  # x slices
                pl.BlockSpec((w, v), lambda b, j: (0, 0)),          # A^T, resident
            ],
            out_specs=pl.BlockSpec((bt, w, lt), lambda b, j: (b, 0, j)),
        ),
        compiler_params=pltpu.CompilerParams(
            dimension_semantics=("parallel", "parallel"),
        ),
    )(x3, At)

    return out3.reshape(n, c, w, l)  # pure view, matches torch .contiguous() order


if __name__ == "__main__":
    key = jax.random.PRNGKey(0)
    kx, ka = jax.random.split(key)

    # Small shapes implied by the einsum: batch=2, channels=4, nodes v=16, seq l=8, w=16.
    n, c, v, l, w = 2, 4, 16, 8, 16
    x = jax.random.normal(kx, (n, c, v, l), dtype=jnp.float32)
    A = jax.random.normal(ka, (v, w), dtype=jnp.float32)

    out = nconv(x, A)
    out = jax.block_until_ready(out)

    # Reference check against plain-JAX einsum (same semantics as torch.einsum).
    ref = jnp.einsum("ncvl,vw->ncwl", x, A)
    assert out.shape == (n, c, w, l), out.shape
    assert jnp.allclose(out, ref, atol=1e-4, rtol=1e-4), "mismatch vs reference"

    print("KERNEL_OK")
</pallas_src>

<mosaic_0001>
module attributes {stable_mosaic.version = 11 : i64} {
  func.func @_nconv_kernel(%arg0: i32, %arg1: i32, %arg2: memref<8x16x8xf32, #tpu.memory_space<vmem>>, %arg3: memref<16x16xf32, #tpu.memory_space<vmem>>, %arg4: memref<8x16x8xf32, #tpu.memory_space<vmem>>) attributes {dimension_semantics = [#tpu.dimension_semantics<parallel>, #tpu.dimension_semantics<parallel>], iteration_bounds = array<i64: 1, 1>, scalar_prefetch = 0 : i64, scratch_operands = 0 : i64, tpu.core_type = #tpu.core_type<tc>, window_params = [{transform_indices = @transform_0, window_bounds = array<i64: 8, 16, 8>}, {pipeline_mode = #tpu.pipeline_mode<synchronous>, transform_indices = @transform_1, window_bounds = array<i64: 16, 16>}, {transform_indices = @transform_2, window_bounds = array<i64: 8, 16, 8>}]} {
    %c0 = arith.constant 0 : index
    %c0_0 = arith.constant 0 : index
    %0 = vector.load %arg3[%c0, %c0_0] : memref<16x16xf32, #tpu.memory_space<vmem>>, vector<16x16xf32>
    %c0_1 = arith.constant 0 : index
    %c0_2 = arith.constant 0 : index
    %c0_3 = arith.constant 0 : index
    %1 = vector.load %arg2[%c0_1, %c0_2, %c0_3] : memref<8x16x8xf32, #tpu.memory_space<vmem>>, vector<1x16x8xf32>
    %2 = vector.shape_cast %1 : vector<1x16x8xf32> to vector<16x8xf32>
    %cst = arith.constant dense<0.000000e+00> : vector<16x8xf32>
    %3 = tpu.matmul %0, %2, %cst {dimension_numbers = #tpu.dot_dimension_numbers<[1], [0], [0], [1], [0, 0, 1, 1], [], []>} : vector<16x16xf32>, vector<16x8xf32>, vector<16x8xf32> -> vector<16x8xf32>
    %c0_4 = arith.constant 0 : index
    %c0_5 = arith.constant 0 : index
    %c0_6 = arith.constant 0 : index
    %4 = vector.load %arg4[%c0_4, %c0_5, %c0_6] : memref<8x16x8xf32, #tpu.memory_space<vmem>>, vector<1x16x8xf32>
    %5 = vector.shape_cast %4 : vector<1x16x8xf32> to vector<16x8xf32>
    %6 = vector.shape_cast %3 : vector<16x8xf32> to vector<1x16x8xf32>
    tpu.vector_store %arg4[%c0_4, %c0_5, %c0_6], %6 {strides = array<i32>} : memref<8x16x8xf32, #tpu.memory_space<vmem>>, vector<1x16x8xf32>,
    %c1 = arith.constant 1 : index
    %c0_7 = arith.constant 0 : index
    %c0_8 = arith.constant 0 : index
    %7 = vector.load %arg2[%c1, %c0_7, %c0_8] : memref<8x16x8xf32, #tpu.memory_space<vmem>>, vector<1x16x8xf32>
    %8 = vector.shape_cast %7 : vector<1x16x8xf32> to vector<16x8xf32>
    %cst_9 = arith.constant dense<0.000000e+00> : vector<16x8xf32>
    %9 = tpu.matmul %0, %8, %cst_9 {dimension_numbers = #tpu.dot_dimension_numbers<[1], [0], [0], [1], [0, 0, 1, 1], [], []>} : vector<16x16xf32>, vector<16x8xf32>, vector<16x8xf32> -> vector<16x8xf32>
    %c1_10 = arith.constant 1 : index
    %c0_11 = arith.constant 0 : index
    %c0_12 = arith.constant 0 : index
    %10 = vector.load %arg4[%c1_10, %c0_11, %c0_12] : memref<8x16x8xf32, #tpu.memory_space<vmem>>, vector<1x16x8xf32>
    %11 = vector.shape_cast %10 : vector<1x16x8xf32> to vector<16x8xf32>
    %12 = vector.shape_cast %9 : vector<16x8xf32> to vector<1x16x8xf32>
    tpu.vector_store %arg4[%c1_10, %c0_11, %c0_12], %12 {strides = array<i32>} : memref<8x16x8xf32, #tpu.memory_space<vmem>>, vector<1x16x8xf32>,
    %c2 = arith.constant 2 : index
    %c0_13 = arith.constant 0 : index
    %c0_14 = arith.constant 0 : index
    %13 = vector.load %arg2[%c2, %c0_13, %c0_14] : memref<8x16x8xf32, #tpu.memory_space<vmem>>, vector<1x16x8xf32>
    %14 = vector.shape_cast %13 : vector<1x16x8xf32> to vector<16x8xf32>
    %cst_15 = arith.constant dense<0.000000e+00> : vector<16x8xf32>
    %15 = tpu.matmul %0, %14, %cst_15 {dimension_numbers = #tpu.dot_dimension_numbers<[1], [0], [0], [1], [0, 0, 1, 1], [], []>} : vector<16x16xf32>, vector<16x8xf32>, vector<16x8xf32> -> vector<16x8xf32>
    %c2_16 = arith.constant 2 : index
    %c0_17 = arith.constant 0 : index
    %c0_18 = arith.constant 0 : index
    %16 = vector.load %arg4[%c2_16, %c0_17, %c0_18] : memref<8x16x8xf32, #tpu.memory_space<vmem>>, vector<1x16x8xf32>
    %17 = vector.shape_cast %16 : vector<1x16x8xf32> to vector<16x8xf32>
    %18 = vector.shape_cast %15 : vector<16x8xf32> to vector<1x16x8xf32>
    tpu.vector_store %arg4[%c2_16, %c0_17, %c0_18], %18 {strides = array<i32>} : memref<8x16x8xf32, #tpu.memory_space<vmem>>, vector<1x16x8xf32>,
    %c3 = arith.constant 3 : index
    %c0_19 = arith.constant 0 : index
    %c0_20 = arith.constant 0 : index
    %19 = vector.load %arg2[%c3, %c0_19, %c0_20] : memref<8x16x8xf32, #tpu.memory_space<vmem>>, vector<1x16x8xf32>
    %20 = vector.shape_cast %19 : vector<1x16x8xf32> to vector<16x8xf32>
    %cst_21 = arith.constant dense<0.000000e+00> : vector<16x8xf32>
    %21 = tpu.matmul %0, %20, %cst_21 {dimension_numbers = #tpu.dot_dimension_numbers<[1], [0], [0], [1], [0, 0, 1, 1], [], []>} : vector<16x16xf32>, vector<16x8xf32>, vector<16x8xf32> -> vector<16x8xf32>
    %c3_22 = arith.constant 3 : index
    %c0_23 = arith.constant 0 : index
    %c0_24 = arith.constant 0 : index
    %22 = vector.load %arg4[%c3_22, %c0_23, %c0_24] : memref<8x16x8xf32, #tpu.memory_space<vmem>>, vector<1x16x8xf32>
    %23 = vector.shape_cast %22 : vector<1x16x8xf32> to vector<16x8xf32>
    %24 = vector.shape_cast %21 : vector<16x8xf32> to vector<1x16x8xf32>
    tpu.vector_store %arg4[%c3_22, %c0_23, %c0_24], %24 {strides = array<i32>} : memref<8x16x8xf32, #tpu.memory_space<vmem>>, vector<1x16x8xf32>,
    %c4 = arith.constant 4 : index
    %c0_25 = arith.constant 0 : index
    %c0_26 = arith.constant 0 : index
    %25 = vector.load %arg2[%c4, %c0_25, %c0_26] : memref<8x16x8xf32, #tpu.memory_space<vmem>>, vector<1x16x8xf32>
    %26 = vector.shape_cast %25 : vector<1x16x8xf32> to vector<16x8xf32>
    %cst_27 = arith.constant dense<0.000000e+00> : vector<16x8xf32>
    %27 = tpu.matmul %0, %26, %cst_27 {dimension_numbers = #tpu.dot_dimension_numbers<[1], [0], [0], [1], [0, 0, 1, 1], [], []>} : vector<16x16xf32>, vector<16x8xf32>, vector<16x8xf32> -> vector<16x8xf32>
    %c4_28 = arith.constant 4 : index
    %c0_29 = arith.constant 0 : index
    %c0_30 = arith.constant 0 : index
    %28 = vector.load %arg4[%c4_28, %c0_29, %c0_30] : memref<8x16x8xf32, #tpu.memory_space<vmem>>, vector<1x16x8xf32>
    %29 = vector.shape_cast %28 : vector<1x16x8xf32> to vector<16x8xf32>
    %30 = vector.shape_cast %27 : vector<16x8xf32> to vector<1x16x8xf32>
    tpu.vector_store %arg4[%c4_28, %c0_29, %c0_30], %30 {strides = array<i32>} : memref<8x16x8xf32, #tpu.memory_space<vmem>>, vector<1x16x8xf32>,
    %c5 = arith.constant 5 : index
    %c0_31 = arith.constant 0 : index
    %c0_32 = arith.constant 0 : index
    %31 = vector.load %arg2[%c5, %c0_31, %c0_32] : memref<8x16x8xf32, #tpu.memory_space<vmem>>, vector<1x16x8xf32>
    %32 = vector.shape_cast %31 : vector<1x16x8xf32> to vector<16x8xf32>
    %cst_33 = arith.constant dense<0.000000e+00> : vector<16x8xf32>
    %33 = tpu.matmul %0, %32, %cst_33 {dimension_numbers = #tpu.dot_dimension_numbers<[1], [0], [0], [1], [0, 0, 1, 1], [], []>} : vector<16x16xf32>, vector<16x8xf32>, vector<16x8xf32> -> vector<16x8xf32>
    %c5_34 = arith.constant 5 : index
    %c0_35 = arith.constant 0 : index
    %c0_36 = arith.constant 0 : index
    %34 = vector.load %arg4[%c5_34, %c0_35, %c0_36] : memref<8x16x8xf32, #tpu.memory_space<vmem>>, vector<1x16x8xf32>
    %35 = vector.shape_cast %34 : vector<1x16x8xf32> to vector<16x8xf32>
    %36 = vector.shape_cast %33 : vector<16x8xf32> to vector<1x16x8xf32>
    tpu.vector_store %arg4[%c5_34, %c0_35, %c0_36], %36 {strides = array<i32>} : memref<8x16x8xf32, #tpu.memory_space<vmem>>, vector<1x16x8xf32>,
    %c6 = arith.constant 6 : index
    %c0_37 = arith.constant 0 : index
    %c0_38 = arith.constant 0 : index
    %37 = vector.load %arg2[%c6, %c0_37, %c0_38] : memref<8x16x8xf32, #tpu.memory_space<vmem>>, vector<1x16x8xf32>
    %38 = vector.shape_cast %37 : vector<1x16x8xf32> to vector<16x8xf32>
    %cst_39 = arith.constant dense<0.000000e+00> : vector<16x8xf32>
    %39 = tpu.matmul %0, %38, %cst_39 {dimension_numbers = #tpu.dot_dimension_numbers<[1], [0], [0], [1], [0, 0, 1, 1], [], []>} : vector<16x16xf32>, vector<16x8xf32>, vector<16x8xf32> -> vector<16x8xf32>
    %c6_40 = arith.constant 6 : index
    %c0_41 = arith.constant 0 : index
    %c0_42 = arith.constant 0 : index
    %40 = vector.load %arg4[%c6_40, %c0_41, %c0_42] : memref<8x16x8xf32, #tpu.memory_space<vmem>>, vector<1x16x8xf32>
    %41 = vector.shape_cast %40 : vector<1x16x8xf32> to vector<16x8xf32>
    %42 = vector.shape_cast %39 : vector<16x8xf32> to vector<1x16x8xf32>
    tpu.vector_store %arg4[%c6_40, %c0_41, %c0_42], %42 {strides = array<i32>} : memref<8x16x8xf32, #tpu.memory_space<vmem>>, vector<1x16x8xf32>,
    %c7 = arith.constant 7 : index
    %c0_43 = arith.constant 0 : index
    %c0_44 = arith.constant 0 : index
    %43 = vector.load %arg2[%c7, %c0_43, %c0_44] : memref<8x16x8xf32, #tpu.memory_space<vmem>>, vector<1x16x8xf32>
    %44 = vector.shape_cast %43 : vector<1x16x8xf32> to vector<16x8xf32>
    %cst_45 = arith.constant dense<0.000000e+00> : vector<16x8xf32>
    %45 = tpu.matmul %0, %44, %cst_45 {dimension_numbers = #tpu.dot_dimension_numbers<[1], [0], [0], [1], [0, 0, 1, 1], [], []>} : vector<16x16xf32>, vector<16x8xf32>, vector<16x8xf32> -> vector<16x8xf32>
    %c7_46 = arith.constant 7 : index
    %c0_47 = arith.constant 0 : index
    %c0_48 = arith.constant 0 : index
    %46 = vector.load %arg4[%c7_46, %c0_47, %c0_48] : memref<8x16x8xf32, #tpu.memory_space<vmem>>, vector<1x16x8xf32>
    %47 = vector.shape_cast %46 : vector<1x16x8xf32> to vector<16x8xf32>
    %48 = vector.shape_cast %45 : vector<16x8xf32> to vector<1x16x8xf32>
    tpu.vector_store %arg4[%c7_46, %c0_47, %c0_48], %48 {strides = array<i32>} : memref<8x16x8xf32, #tpu.memory_space<vmem>>, vector<1x16x8xf32>,
    return
  }
  func.func @transform_0(%arg0: i32, %arg1: i32) -> (i32, i32, i32) {
    %c0_i32 = arith.constant 0 : i32
    %c0_i32_0 = arith.constant 0 : i32
    return %arg0, %c0_i32, %arg1 : i32, i32, i32
  }
  func.func @transform_1(%arg0: i32, %arg1: i32) -> (i32, i32) {
    %c0_i32 = arith.constant 0 : i32
    %c0_i32_0 = arith.constant 0 : i32
    %c0_i32_1 = arith.constant 0 : i32
    return %c0_i32, %c0_i32_0 : i32, i32
  }
  func.func @transform_2(%arg0: i32, %arg1: i32) -> (i32, i32, i32) {
    %c0_i32 = arith.constant 0 : i32
    %c0_i32_0 = arith.constant 0 : i32
    return %arg0, %c0_i32, %arg1 : i32, i32, i32
  }
}

</mosaic_0001>

<bundles_post_ra>
// kernel: tpu_custom_call.1
= control target key start
LH: loop header
LB: loop body
LE: loop exit
PB: predicated region body
PF: predicated region fallthrough
CT: control target
= control target key end

     0   :  { %vm15_vm0 = vcmask 130048   ;;  %vm97_vm1 = vcmask 64512   ;;  %s952_s0 = inlined_call_operand.vmem [shape: f32[8,16,8], index: 0, kind: input, shape index: {}]   ;;  %s953_s1 = inlined_call_operand.vmem [shape: f32[16,16], index: 1, kind: input, shape index: {}]   ;;  %s954_s2 = inlined_call_operand.vmem [shape: f32[8,16,8], index: 2, kind: output, shape index: {}]  }
   0x1   :  { %v14_v0 = vld [vmem:[%s952_s0 + $0x8] sm:$0xff]  ;;  %v674_v1 = vld [vmem:[%s952_s0 + $0x18] sm:$0xff]  ;;  %v13_v2 = vld [vmem:[%s952_s0] sm:$0xff] }
   0x2   :  { %747 = vmatprep.subr.mxu0 %v14_v0  ;;  %754 = vmatprep.subr.mxu1 %v674_v1  ;;  %v673_v3 = vld [vmem:[%s952_s0 + $0x10] sm:$0xff]  ;;  %v11_v4 = vld [vmem:[%s953_s1] sm:$0xff]  ;;  %v12_v5 = vld [vmem:[%s953_s1 + $0x8] sm:$0xff] }
   0x3   :  { %748 = vmatpush3.msra.mxu0 %v14_v0  ;;  %755 = vmatpush3.msra.mxu1 %v674_v1  ;;  %v680_v6 = vld [vmem:[%s952_s0 + $0x28] sm:$0xff]  ;;  %v686_v7 = vld [vmem:[%s952_s0 + $0x38] sm:$0xff]  ;;  %v679_v8 = vld [vmem:[%s952_s0 + $0x20] sm:$0xff] }
   0x4   :  { %749 = vmatprep.subr.mxu0 %v13_v2  ;;  %756 = vmatprep.subr.mxu1 %v673_v3  ;;  %v685_v9 = vld [vmem:[%s952_s0 + $0x30] sm:$0xff]  ;;  %v692_v10 = vld [vmem:[%s952_s0 + $0x48] sm:$0xff]  ;;  %v698_v11 = vld [vmem:[%s952_s0 + $0x58] sm:$0xff] }
   0x5   :  { %750 = vmatpush3.msra.mxu0 %v13_v2  ;;  %751 = vmatprep.mubr.msk.f32.mxu0 %vm15_vm0, %v11_v4  ;;  %v691_v12 = vld [vmem:[%s952_s0 + $0x40] sm:$0xff]  ;;  %v697_v13 = vld [vmem:[%s952_s0 + $0x50] sm:$0xff]  ;;  %v704_v14 = vld [vmem:[%s952_s0 + $0x68] sm:$0xff] }
   0x6   :  { %757 = vmatpush3.msra.mxu1 %v673_v3  ;;  %758 = vmatprep.mubr.msk.f32.mxu1 %vm15_vm0, %v11_v4  ;;  %v710_v15 = vld [vmem:[%s952_s0 + $0x78] sm:$0xff]  ;;  %v703_v16 = vld [vmem:[%s952_s0 + $0x60] sm:$0xff]  ;;  %v709_v17 = vld [vmem:[%s952_s0 + $0x70] sm:$0xff] }
   0x7   :  { %752 = vmatmul.mubr.msk.f32.vlgmr.msra.gmra.mxu0 %vm15_vm0, %v12_v5  ;;  %759 = vmatmul.mubr.msk.f32.vlgmr.msra.gmra.mxu1 %vm15_vm0, %v12_v5 }
   0x8   :  { %761 = vmatprep.subr.mxu0 %v680_v6  ;;  %768 = vmatprep.subr.mxu1 %v686_v7 }
   0x9   :  { %762 = vmatpush3.msra.mxu0 %v680_v6  ;;  %769 = vmatpush3.msra.mxu1 %v686_v7 }
   0xa   :  { %763 = vmatprep.subr.mxu0 %v679_v8  ;;  %770 = vmatprep.subr.mxu1 %v685_v9 }
   0xb   :  { %764 = vmatpush3.msra.mxu0 %v679_v8  ;;  %765 = vmatprep.mubr.msk.f32.mxu0 %vm15_vm0, %v11_v4 }
   0xc   :  { %771 = vmatpush3.msra.mxu1 %v685_v9  ;;  %772 = vmatprep.mubr.msk.f32.mxu1 %vm15_vm0, %v11_v4 }
   0xd   :  { %766 = vmatmul.mubr.msk.f32.vlgmr.msra.gmra.mxu0 %vm15_vm0, %v12_v5  ;;  %773 = vmatmul.mubr.msk.f32.vlgmr.msra.gmra.mxu1 %vm15_vm0, %v12_v5 }
   0xe   :  { %775 = vmatprep.subr.mxu0 %v692_v10  ;;  %782 = vmatprep.subr.mxu1 %v698_v11 }
   0xf   :  { %776 = vmatpush3.msra.mxu0 %v692_v10  ;;  %783 = vmatpush3.msra.mxu1 %v698_v11 }
  0x10   :  { %777 = vmatprep.subr.mxu0 %v691_v12  ;;  %784 = vmatprep.subr.mxu1 %v697_v13 }
  0x11   :  { %778 = vmatpush3.msra.mxu0 %v691_v12  ;;  %779 = vmatprep.mubr.msk.f32.mxu0 %vm15_vm0, %v11_v4 }
  0x12   :  { %785 = vmatpush3.msra.mxu1 %v697_v13  ;;  %786 = vmatprep.mubr.msk.f32.mxu1 %vm15_vm0, %v11_v4 }
  0x13   :  { %780 = vmatmul.mubr.msk.f32.vlgmr.msra.gmra.mxu0 %vm15_vm0, %v12_v5  ;;  %787 = vmatmul.mubr.msk.f32.vlgmr.msra.gmra.mxu1 %vm15_vm0, %v12_v5 }
  0x14   :  { %789 = vmatprep.subr.mxu0 %v704_v14  ;;  %796 = vmatprep.subr.mxu1 %v710_v15 }
  0x15   :  { %790 = vmatpush3.msra.mxu0 %v704_v14  ;;  %797 = vmatpush3.msra.mxu1 %v710_v15 }
  0x16   :  { %791 = vmatprep.subr.mxu0 %v703_v16  ;;  %798 = vmatprep.subr.mxu1 %v709_v17 }
  0x17   :  { %792 = vmatpush3.msra.mxu0 %v703_v16  ;;  %793 = vmatprep.mubr.msk.f32.mxu0 %vm15_vm0, %v11_v4 }
  0x18   :  { %799 = vmatpush3.msra.mxu1 %v709_v17  ;;  %800 = vmatprep.mubr.msk.f32.mxu1 %vm15_vm0, %v11_v4 }
  0x19   :  { %794 = vmatmul.mubr.msk.f32.vlgmr.msra.gmra.mxu0 %vm15_vm0, %v12_v5  ;;  %801 = vmatmul.mubr.msk.f32.vlgmr.msra.gmra.mxu1 %vm15_vm0, %v12_v5 }
  0xc7   :  { %v753_v18 = vpop.f32.mrf.mxu0  ;;  %v760_v19 = vpop.f32.mrf.mxu1 }
  0xc8   :  { %99 = vst.msk [vmem:[%s954_s2 + $0x8] sm:$0xff] %vm97_vm1, %v753_v18  ;;  %678 = vst.msk [vmem:[%s954_s2 + $0x18] sm:$0xff] %vm97_vm1, %v760_v19 }
  0xc9   :  { %v88_v20 = vpop.f32.mrf.mxu0  ;;  %v169_v21 = vpop.f32.mrf.mxu1 }
  0xca   :  { %98 = vst.msk [vmem:[%s954_s2] sm:$0xff] %vm97_vm1, %v88_v20  ;;  %677 = vst.msk [vmem:[%s954_s2 + $0x10] sm:$0xff] %vm97_vm1, %v169_v21 }
  0xcd   :  { %v767_v22 = vpop.f32.mrf.mxu0  ;;  %v774_v23 = vpop.f32.mrf.mxu1 }
  0xce   :  { %684 = vst.msk [vmem:[%s954_s2 + $0x28] sm:$0xff] %vm97_vm1, %v767_v22  ;;  %690 = vst.msk [vmem:[%s954_s2 + $0x38] sm:$0xff] %vm97_vm1, %v774_v23 }
  0xcf   :  { %v250_v24 = vpop.f32.mrf.mxu0  ;;  %v331_v25 = vpop.f32.mrf.mxu1 }
  0xd0   :  { %683 = vst.msk [vmem:[%s954_s2 + $0x20] sm:$0xff] %vm97_vm1, %v250_v24  ;;  %689 = vst.msk [vmem:[%s954_s2 + $0x30] sm:$0xff] %vm97_vm1, %v331_v25 }
  0xd3   :  { %v781_v26 = vpop.f32.mrf.mxu0  ;;  %v788_v27 = vpop.f32.mrf.mxu1 }
  0xd4   :  { %696 = vst.msk [vmem:[%s954_s2 + $0x48] sm:$0xff] %vm97_vm1, %v781_v26  ;;  %702 = vst.msk [vmem:[%s954_s2 + $0x58] sm:$0xff] %vm97_vm1, %v788_v27 }
  0xd5   :  { %v412_v28 = vpop.f32.mrf.mxu0  ;;  %v493_v29 = vpop.f32.mrf.mxu1 }
  0xd6   :  { %695 = vst.msk [vmem:[%s954_s2 + $0x40] sm:$0xff] %vm97_vm1, %v412_v28  ;;  %701 = vst.msk [vmem:[%s954_s2 + $0x50] sm:$0xff] %vm97_vm1, %v493_v29 }
  0xd9   :  { %v795_v30 = vpop.f32.mrf.mxu0  ;;  %v802_v31 = vpop.f32.mrf.mxu1 }
  0xda   :  { %708 = vst.msk [vmem:[%s954_s2 + $0x68] sm:$0xff] %vm97_vm1, %v795_v30  ;;  %714 = vst.msk [vmem:[%s954_s2 + $0x78] sm:$0xff] %vm97_vm1, %v802_v31 }
  0xdb   :  { %v574_v32 = vpop.f32.mrf.mxu0  ;;  %v655_v33 = vpop.f32.mrf.mxu1 }
  0xdc   :  { %707 = vst.msk [vmem:[%s954_s2 + $0x60] sm:$0xff] %vm97_vm1, %v574_v32  ;;  %713 = vst.msk [vmem:[%s954_s2 + $0x70] sm:$0xff] %vm97_vm1, %v655_v33 }

</bundles_post_ra>
